<compile_context>
chip_gen: v6e
topology: v6e:2x2x1
jax: 0.10.0
libtpu: 0.0.40
codegen_flags: <defaults>
</compile_context>

<pallas_src>
import functools

import jax
import jax.numpy as jnp
from jax.experimental import pallas as pl
from jax.experimental.pallas import tpu as pltpu


def _pearson_score_kernel(x1_ref, x2_ref, out_ref):
    """Per-row Pearson correlation score for one (TB, D) tile."""
    x = x1_ref[...].astype(jnp.float32)          # [TB, D]
    y = x2_ref[...].astype(jnp.float32)          # [TB, D]
    n = jnp.float32(x.shape[1])

    sum1 = jnp.sum(x, axis=1, keepdims=True)     # [TB, 1]
    sum2 = jnp.sum(y, axis=1, keepdims=True)
    sum1_pow = jnp.sum(x * x, axis=1, keepdims=True)
    sum2_pow = jnp.sum(y * y, axis=1, keepdims=True)
    p_sum = jnp.sum(x * y, axis=1, keepdims=True)

    num = p_sum - sum1 * sum2 / n
    var1 = sum1_pow - sum1 * sum1 / n
    var2 = sum2_pow - sum2 * sum2 / n
    den_sq = var1 * var2

    # Guard <= 0 (not just == 0): tiny negative variance from f32 cancellation
    # would otherwise NaN the rsqrt.  den==0 -> score 0, matching the reference.
    is_zero = den_sq <= 0.0
    inv_den = jax.lax.rsqrt(jnp.where(is_zero, 1.0, den_sq))  # EUP slot
    out_ref[...] = jnp.where(is_zero, 0.0, num * inv_den)     # [TB, 1]


def _round_up(v, m):
    return ((v + m - 1) // m) * m


def _pick_batch_tile(batch, feat_dim, itemsize):
    """Pick a batch tile so each input tile is ~2 MiB (double-buffered x 2
    inputs ~= 8 MiB of VMEM, safe on v5e/v6e/v7x defaults)."""
    target_tile_bytes = 2 * 1024 * 1024
    tb = max(8, (target_tile_bytes // max(1, feat_dim * itemsize)) // 8 * 8)
    tb = min(tb, _round_up(batch, 8))
    b_pad = _round_up(batch, tb)
    return tb, b_pad


def _pearson_scores(x1, x2):
    """Pallas-computed per-row Pearson score, shape [B]."""
    B, D = x1.shape
    itemsize = jnp.dtype(x1.dtype).itemsize
    tb, b_pad = _pick_batch_tile(B, D, itemsize)

    if b_pad != B:
        pad = ((0, b_pad - B), (0, 0))
        x1 = jnp.pad(x1, pad)
        x2 = jnp.pad(x2, pad)

    grid = (b_pad // tb,)
    scores = pl.pallas_call(
        _pearson_score_kernel,
        out_shape=jax.ShapeDtypeStruct((b_pad, 1), jnp.float32),
        grid=grid,
        in_specs=[
            pl.BlockSpec((tb, D), lambda i: (i, 0)),
            pl.BlockSpec((tb, D), lambda i: (i, 0)),
        ],
        out_specs=pl.BlockSpec((tb, 1), lambda i: (i, 0)),
        compiler_params=pltpu.CompilerParams(
            dimension_semantics=("parallel",),
        ),
    )(x1, x2)
    return scores[:B, 0]


class PearsonEmbeddingLoss:
    """JAX/Pallas re-implementation of mmaction PearsonEmbeddingLoss."""

    def __init__(self, margin=0.0):
        self.margin = float(margin)

    def __call__(self, x1, x2, target, reduction="mean"):
        batch_size = x1.shape[0]
        target = jnp.asarray(target)
        if target.shape[0] == 1:
            target = jnp.repeat(target, batch_size, axis=0)
        assert x1.shape == x2.shape
        if x1.ndim == 3:
            # Match torch: view(-1, D) but only loop over first `batch_size` rows.
            d = x1.shape[-1]
            x1 = x1.reshape(-1, d)[:batch_size]
            x2 = x2.reshape(-1, d)[:batch_size]

        # Do NOT force f32 here: bf16 inputs are DMA'd as bf16 (half the HBM
        # traffic); the kernel casts to f32 for the reductions.
        scores = _pearson_scores(x1, x2)                       # [B]

        tgt = target.astype(jnp.float32).reshape(-1)[:batch_size]
        pos_loss = 1.0 - scores
        neg_loss = jnp.maximum(0.0, scores - jnp.float32(self.margin))
        loss = jnp.where(tgt == 1.0, pos_loss, neg_loss)

        if reduction == "mean":
            return jnp.mean(loss)
        elif reduction == "sum":
            return jnp.sum(loss)
        else:
            raise ValueError(f"unsupported reduction: {reduction}")


def _reference(x1, x2, target, margin=0.0, reduction="mean"):
    """Pure-JAX reference replicating the torch loop semantics."""
    B, n = x1.shape
    x1 = x1.astype(jnp.float32)
    x2 = x2.astype(jnp.float32)
    sum1 = x1.sum(-1)
    sum2 = x2.sum(-1)
    s1p = (x1 * x1).sum(-1)
    s2p = (x2 * x2).sum(-1)
    ps = (x1 * x2).sum(-1)
    num = ps - sum1 * sum2 / n
    den = jnp.sqrt((s1p - sum1**2 / n) * (s2p - sum2**2 / n))
    score = jnp.where(den == 0.0, 0.0, num / jnp.where(den == 0.0, 1.0, den))
    loss = jnp.where(target == 1, 1.0 - score, jnp.maximum(0.0, score - margin))
    return loss.mean() if reduction == "mean" else loss.sum()


if __name__ == "__main__":
    key = jax.random.PRNGKey(0)
    k1, k2, k3 = jax.random.split(key, 3)

    B, D = 8, 128  # small, lane-aligned shapes
    x1 = jax.random.normal(k1, (B, D), dtype=jnp.float32)
    x2 = jax.random.normal(k2, (B, D), dtype=jnp.float32)
    # +1 / -1 targets, like torch embedding losses
    target = jnp.where(jax.random.bernoulli(k3, 0.5, (B,)), 1, -1).astype(jnp.int32)

    loss_fn = PearsonEmbeddingLoss(margin=0.0)

    out_mean = loss_fn(x1, x2, target, reduction="mean")
    out_sum = loss_fn(x1, x2, target, reduction="sum")
    jax.block_until_ready(out_mean)
    jax.block_until_ready(out_sum)

    ref_mean = _reference(x1, x2, target, margin=0.0, reduction="mean")
    ref_sum = _reference(x1, x2, target, margin=0.0, reduction="sum")
    assert jnp.allclose(out_mean, ref_mean, atol=1e-5, rtol=1e-5), (out_mean, ref_mean)
    assert jnp.allclose(out_sum, ref_sum, atol=1e-5, rtol=1e-5), (out_sum, ref_sum)

    # Exercise the batch-tiling / padding path (B not a multiple of 8, larger B).
    B2, D2 = 37, 256
    k4, k5, k6 = jax.random.split(k3, 3)
    y1 = jax.random.normal(k4, (B2, D2), dtype=jnp.float32)
    y2 = jax.random.normal(k5, (B2, D2), dtype=jnp.float32)
    tgt2 = jnp.where(jax.random.bernoulli(k6, 0.5, (B2,)), 1, -1).astype(jnp.int32)
    out2 = loss_fn(y1, y2, tgt2, reduction="mean")
    jax.block_until_ready(out2)
    ref2 = _reference(y1, y2, tgt2, margin=0.0, reduction="mean")
    assert jnp.allclose(out2, ref2, atol=1e-5, rtol=1e-5), (out2, ref2)

    print("KERNEL_OK")
</pallas_src>

<mosaic_0001>
module attributes {stable_mosaic.version = 11 : i64} {
  func.func @_pearson_score_kernel(%arg0: i32, %arg1: memref<8x128xf32, #tpu.memory_space<vmem>>, %arg2: memref<8x128xf32, #tpu.memory_space<vmem>>, %arg3: memref<8x1xf32, #tpu.memory_space<vmem>>) attributes {dimension_semantics = [#tpu.dimension_semantics<parallel>], iteration_bounds = array<i64: 1>, scalar_prefetch = 0 : i64, scratch_operands = 0 : i64, tpu.core_type = #tpu.core_type<tc>, window_params = [{transform_indices = @transform_0, window_bounds = array<i64: 8, 128>}, {transform_indices = @transform_1, window_bounds = array<i64: 8, 128>}, {transform_indices = @transform_2, window_bounds = array<i64: 8, 1>}]} {
    %c0 = arith.constant 0 : index
    %c0_0 = arith.constant 0 : index
    %0 = vector.load %arg1[%c0, %c0_0] : memref<8x128xf32, #tpu.memory_space<vmem>>, vector<8x128xf32>
    %c0_1 = arith.constant 0 : index
    %c0_2 = arith.constant 0 : index
    %1 = vector.load %arg2[%c0_1, %c0_2] : memref<8x128xf32, #tpu.memory_space<vmem>>, vector<8x128xf32>
    %cst = arith.constant dense<0.000000e+00> : vector<8xf32>
    %2 = vector.multi_reduction <add>, %0, %cst [1] : vector<8x128xf32> to vector<8xf32>
    %3 = vector.shape_cast %2 : vector<8xf32> to vector<8x1xf32>
    %cst_3 = arith.constant dense<0.000000e+00> : vector<8xf32>
    %4 = vector.multi_reduction <add>, %1, %cst_3 [1] : vector<8x128xf32> to vector<8xf32>
    %5 = vector.shape_cast %4 : vector<8xf32> to vector<8x1xf32>
    %6 = arith.mulf %0, %0 : vector<8x128xf32>
    %cst_4 = arith.constant dense<0.000000e+00> : vector<8xf32>
    %7 = vector.multi_reduction <add>, %6, %cst_4 [1] : vector<8x128xf32> to vector<8xf32>
    %8 = vector.shape_cast %7 : vector<8xf32> to vector<8x1xf32>
    %9 = arith.mulf %1, %1 : vector<8x128xf32>
    %cst_5 = arith.constant dense<0.000000e+00> : vector<8xf32>
    %10 = vector.multi_reduction <add>, %9, %cst_5 [1] : vector<8x128xf32> to vector<8xf32>
    %11 = vector.shape_cast %10 : vector<8xf32> to vector<8x1xf32>
    %12 = arith.mulf %0, %1 : vector<8x128xf32>
    %cst_6 = arith.constant dense<0.000000e+00> : vector<8xf32>
    %13 = vector.multi_reduction <add>, %12, %cst_6 [1] : vector<8x128xf32> to vector<8xf32>
    %14 = vector.shape_cast %13 : vector<8xf32> to vector<8x1xf32>
    %15 = arith.mulf %3, %5 : vector<8x1xf32>
    %cst_7 = arith.constant 1.280000e+02 : f32
    %16 = vector.broadcast %cst_7 : f32 to vector<8x1xf32>
    %17 = arith.divf %15, %16 : vector<8x1xf32>
    %18 = arith.subf %14, %17 : vector<8x1xf32>
    %19 = arith.mulf %3, %3 : vector<8x1xf32>
    %cst_8 = arith.constant 1.280000e+02 : f32
    %20 = vector.broadcast %cst_8 : f32 to vector<8x1xf32>
    %21 = arith.divf %19, %20 : vector<8x1xf32>
    %22 = arith.subf %8, %21 : vector<8x1xf32>
    %23 = arith.mulf %5, %5 : vector<8x1xf32>
    %cst_9 = arith.constant 1.280000e+02 : f32
    %24 = vector.broadcast %cst_9 : f32 to vector<8x1xf32>
    %25 = arith.divf %23, %24 : vector<8x1xf32>
    %26 = arith.subf %11, %25 : vector<8x1xf32>
    %27 = arith.mulf %22, %26 : vector<8x1xf32>
    %cst_10 = arith.constant 0.000000e+00 : f32
    %28 = vector.broadcast %cst_10 : f32 to vector<8x1xf32>
    %29 = arith.cmpf ole, %27, %28 : vector<8x1xf32>
    %cst_11 = arith.constant 1.000000e+00 : f32
    %30 = vector.broadcast %cst_11 : f32 to vector<8x1xf32>
    %31 = arith.select %29, %30, %27 : vector<8x1xi1>, vector<8x1xf32>
    %32 = math.rsqrt %31 : vector<8x1xf32>
    %33 = arith.mulf %18, %32 : vector<8x1xf32>
    %cst_12 = arith.constant 0.000000e+00 : f32
    %34 = vector.broadcast %cst_12 : f32 to vector<8x1xf32>
    %35 = arith.select %29, %34, %33 : vector<8x1xi1>, vector<8x1xf32>
    %c0_13 = arith.constant 0 : index
    %c0_14 = arith.constant 0 : index
    %36 = vector.load %arg3[%c0_13, %c0_14] : memref<8x1xf32, #tpu.memory_space<vmem>>, vector<8x1xf32>
    tpu.vector_store %arg3[%c0_13, %c0_14], %35 {strides = array<i32>} : memref<8x1xf32, #tpu.memory_space<vmem>>, vector<8x1xf32>,
    return
  }
  func.func @transform_0(%arg0: i32) -> (i32, i32) {
    %c0_i32 = arith.constant 0 : i32
    %c0_i32_0 = arith.constant 0 : i32
    return %arg0, %c0_i32 : i32, i32
  }
  func.func @transform_1(%arg0: i32) -> (i32, i32) {
    %c0_i32 = arith.constant 0 : i32
    %c0_i32_0 = arith.constant 0 : i32
    return %arg0, %c0_i32 : i32, i32
  }
  func.func @transform_2(%arg0: i32) -> (i32, i32) {
    %c0_i32 = arith.constant 0 : i32
    %c0_i32_0 = arith.constant 0 : i32
    return %arg0, %c0_i32 : i32, i32
  }
}

</mosaic_0001>

<bundles_post_ra>
// kernel: tpu_custom_call.1
= control target key start
LH: loop header
LB: loop body
LE: loop exit
PB: predicated region body
PF: predicated region fallthrough
CT: control target
= control target key end

     0   :  { %7 = vsyncpa [#allocation3], 0  ;;  %s148_s0 = inlined_call_operand.hbm [shape: f32[8,128], index: 0, kind: input, shape index: {}]   ;;  %s149_s1 = inlined_call_operand.hbm [shape: f32[8,128], index: 1, kind: input, shape index: {}]   ;;  %s150_s2 = inlined_call_operand.vmem [shape: f32[8,1], index: 2, kind: output, shape index: {}]  }
   0x1   :  { %8 = vsyncpa [#allocation5], 0  ;;  %s122_s9 = smov [#allocation2]   ;;  %s123_s11 = smov [#allocation4]  }
   0x2   :  { %s15_s10 = sshll.u32 %s122_s9, 4  ;;  %s25_s12 = sshll.u32 %s123_s11, 4  ;;  %s16_s10 = int_to_ptr.vmem [resolvable:$true] %s15_s10  ;;  %s26_s12 = int_to_ptr.vmem [resolvable:$true] %s25_s12 }
   0x3   :  { %s86_s13 = scalar_lea.vmem %s16_s10, 128  ;;  %p91_p1 = scmp.lt.s32.totalorder %s16_s10, %s16_s10 }
   0x4   :  { %p87_p0 = scmp.ne.s32.totalorder %s16_s10, %s86_s13  ;;  %p92_p2 = scmp.lt.s32.totalorder %s86_s13, %s86_s13 }
   0x6   :  { %p93_p3 = por %p92_p2, %p91_p1 }
   0x8   :  { %p94_p4 = pnand %p93_p3, %p87_p0 }
   0xa   :  { %97 = shalt.err (!%p94_p4)
}
   0xb   :  { %18 = dma.hbm_to_vmem [thread:$0]  %s148_s0, 128, %s16_s10, [#allocation3]  }
   0xc   :  { %s106_s16 = scalar_lea.vmem %s26_s12, 128  ;;  %p111_p6 = scmp.lt.s32.totalorder %s26_s12, %s26_s12 }
   0xd   :  { %p107_p5 = scmp.ne.s32.totalorder %s26_s12, %s106_s16  ;;  %p112_p7 = scmp.lt.s32.totalorder %s106_s16, %s106_s16 }
   0xf   :  { %p113_p8 = por %p112_p7, %p111_p6 }
  0x11   :  { %p114_p9 = pnand %p113_p8, %p107_p5 }
  0x13   :  { %117 = shalt.err (!%p114_p9)
}
  0x14   :  { %28 = dma.hbm_to_vmem [thread:$0]  %s149_s1, 128, %s26_s12, [#allocation5]  }
  0x15   :  { %118 = dma.done.wait [#allocation3], 128  }
  0x16   :  { %119 = vsyncadd [#allocation3], 4294967168 }
  0x17   :  { %120 = dma.done.wait [#allocation5], 128  }
  0x18   :  { %121 = vsyncadd [#allocation5], 4294967168  ;;  %v35_v0 = vld [vmem:[#allocation2] sm:$0xff]  ;;  %v36_v2 = vld [vmem:[#allocation4] sm:$0xff]  ;;  %vm66_vm1 = vcmask 7168  }
  0x19   :  { %37 = vadd.xlane.f32.xlu0 %v35_v0  ;;  %v41_v1 = vmul.f32 %v35_v0, %v35_v0  ;;  %v44_v3 = vmul.f32 %v36_v2, %v36_v2  ;;  %v47_v4 = vmul.f32 %v36_v2, %v35_v0 }
  0x1b   :  { %42 = vadd.xlane.f32.xlu1 %v41_v1 }
  0x1d   :  { %39 = vadd.xlane.f32.xlu0 %v36_v2 }
  0x1f   :  { %45 = vadd.xlane.f32.xlu1 %v44_v3 }
  0x21   :  { %48 = vadd.xlane.f32.xlu0 %v47_v4 }
  0xa2   :  { %v38_v5 = vpop.xlane.xlu0 %37 }
  0xa3   :  { %v54_v6 = vmul.f32 %v38_v5, %v38_v5 }
  0xa4   :  { %v43_v7 = vpop.xlane.xlu1 %42 }
  0xa5   :  { %v55_v9 = vmul.f32 0.0078125, %v54_v6 }
  0xa6   :  { %v40_v8 = vpop.xlane.xlu0 %39 }
  0xa7   :  { %v57_v10 = vmul.f32 %v40_v8, %v40_v8  ;;  %v56_v13 = vsub.f32 %v43_v7, %v55_v9  ;;  %v50_v17 = vmul.f32 %v40_v8, %v38_v5 }
  0xa8   :  { %v46_v11 = vpop.xlane.xlu1 %45 }
  0xa9   :  { %v58_v12 = vmul.f32 0.0078125, %v57_v10  ;;  %v52_v18 = vmul.f32 0.0078125, %v50_v17 }
  0xaa   :  { %v49_v19 = vpop.xlane.xlu0 %48 }
  0xab   :  { %v59_v14 = vsub.f32 %v46_v11, %v58_v12  ;;  %v53_v20 = vsub.f32 %v49_v19, %v52_v18 }
  0xad   :  { %v60_v15 = vmul.f32 %v59_v14, %v56_v13 }
  0xaf   :  { %vm61_vm0 = vcmp.le.f32.partialorder %v60_v15, 0.0 }
  0xb0   :  { %v62_v16 = vsel %vm61_vm0, 1.0, %v60_v15 }
  0xb1   :  { %76 = vrsqrt.f32 %v62_v16 }
  0xbe   :  { %v77_v21 = vpop.eup %76 }
  0xbf   :  { %v64_v22 = vmul.f32 %v77_v21, %v53_v20 }
  0xc1   :  { %v65_v23 = vsel %vm61_vm0, 0.0, %v64_v22 }
  0xc2   :  { %67 = vst.msk [vmem:[%s150_s2] sm:$0xff] %vm66_vm1, %v65_v23 }
  0xc3   :  { %72 = vsyncpa [#allocation3], 1 }
  0xc4   :  { %73 = vsyncpa [#allocation5], 1 }

</bundles_post_ra>
